<compile_context>
chip_gen: v6e
topology: v6e:2x2x1
jax: 0.10.0
libtpu: 0.0.40
codegen_flags: <defaults>
</compile_context>

<pallas_src>
import functools

import jax
import jax.numpy as jnp
from jax.experimental import pallas as pl
from jax.experimental.pallas import tpu as pltpu


def _round_up(x, m):
    return (x + m - 1) // m * m


def _is_v7x():
    try:
        kind = jax.devices()[0].device_kind
    except Exception:
        return False
    k = kind.lower().replace(" ", "")
    return ("v7" in k) or ("tpu7" in k)


def _vmem_capacity_bytes():
    try:
        return int(pltpu.get_tpu_info().vmem_capacity_bytes)
    except Exception:
        return 64 * 1024 * 1024  # v7x-safe fallback (64 MiB per TensorCore)


def _layernorm_kernel(x_ref, alpha_ref, bias_ref, o_ref, *, eps, d_model):
    # x_ref: (tile_rows, d_model) VMEM tile.  Rows in the (possible) partial
    # last block that are out of bounds contain garbage; they are computed on
    # independently per row and their writes are discarded by Pallas.
    x = x_ref[...].astype(jnp.float32)
    alpha = alpha_ref[...].astype(jnp.float32)   # (1, d_model)
    bias = bias_ref[...].astype(jnp.float32)     # (1, d_model)

    mean = jnp.sum(x, axis=-1, keepdims=True) * jnp.float32(1.0 / d_model)
    diff = x - mean

    # torch.std is unbiased (divides by N-1); N == 1 gives NaN, same as torch.
    inv_nm1 = (1.0 / (d_model - 1)) if d_model > 1 else float("nan")
    var = jnp.sum(diff * diff, axis=-1, keepdims=True) * jnp.float32(inv_nm1)
    std = jnp.sqrt(var)

    # Per-row reciprocal (EUP) -> per-element multiply (VPU) instead of divide.
    inv = pl.reciprocal(std + jnp.float32(eps), approx=False)

    o_ref[...] = (diff * inv * alpha + bias).astype(o_ref.dtype)


def layer_norm(x, alpha, bias, eps=1e-6):
    """x: (..., d_model); alpha, bias: (d_model,)."""
    orig_shape = x.shape
    d_model = orig_shape[-1]
    rows = 1
    for s in orig_shape[:-1]:
        rows *= s

    io_itemsize = jnp.dtype(x.dtype).itemsize
    compute_itemsize = 4  # kernel computes in f32
    # Sublane multiple for the IO dtype: 8 (f32), 16 (bf16), 32 (int8/fp8).
    sublane = max(8, 32 // max(io_itemsize, 1))

    # --- tile sizing from VMEM budget (per-generation) ---
    vmem_bytes = _vmem_capacity_bytes()
    vmem_limit = min(int(vmem_bytes * 0.75), 96 * 1024 * 1024)
    # Per-row VMEM bytes: double-buffered input + output tiles + 3 f32 temps
    # (x_f32, diff, y) that are live inside the kernel.
    per_row = 4 * d_model * io_itemsize + 3 * d_model * compute_itemsize
    budget = int(vmem_limit * 0.5)
    tr = max(sublane, (budget // max(per_row, 1)) // sublane * sublane)
    # HBM roofline saturates by 512-1024 rows; also cap each I/O buffer ~4 MiB.
    tr = min(tr, 1024)
    tr_bytes_cap = max(sublane, ((4 << 20) // max(d_model * io_itemsize, 1))
                       // sublane * sublane)
    tr = min(tr, tr_bytes_cap)
    # Never allocate a tile bigger than the (sublane-rounded) problem itself.
    tr = min(tr, max(sublane, _round_up(rows, sublane)))
    # v7x only: 2 TensorCores share the ("parallel",) grid; keep >=4 steps so
    # each core gets >=2 iterations and its DMA/compute pipeline overlaps.
    if _is_v7x() and rows > 4 * sublane:
        tr = min(tr, max(sublane, _round_up(pl.cdiv(rows, 4), sublane)))

    grid = (pl.cdiv(rows, tr),)  # ragged tail -> partial last block, no row pad

    # Leading-dim collapse is a free (metadata-only) reshape; no padding, no
    # post-slice -> no extra HBM passes.
    x2d = x.reshape(rows, d_model)
    alpha2d = alpha.reshape(1, d_model)
    bias2d = bias.reshape(1, d_model)

    kernel = functools.partial(_layernorm_kernel, eps=eps, d_model=d_model)

    cost = pl.CostEstimate(
        flops=8 * rows * d_model,
        transcendentals=2 * rows,  # sqrt + reciprocal per row
        bytes_accessed=2 * rows * d_model * io_itemsize
        + 2 * d_model * jnp.dtype(alpha.dtype).itemsize,
    )

    out2d = pl.pallas_call(
        kernel,
        out_shape=jax.ShapeDtypeStruct((rows, d_model), x.dtype),
        grid_spec=pltpu.PrefetchScalarGridSpec(
            num_scalar_prefetch=0,
            grid=grid,
            in_specs=[
                pl.BlockSpec((tr, d_model), lambda i: (i, 0)),
                pl.BlockSpec((1, d_model), lambda i: (0, 0)),
                pl.BlockSpec((1, d_model), lambda i: (0, 0)),
            ],
            out_specs=pl.BlockSpec((tr, d_model), lambda i: (i, 0)),
        ),
        compiler_params=pltpu.CompilerParams(
            dimension_semantics=("parallel",),
            vmem_limit_bytes=vmem_limit,
        ),
        cost_estimate=cost,
    )(x2d, alpha2d, bias2d)

    return out2d.reshape(orig_shape)


if __name__ == "__main__":
    key = jax.random.PRNGKey(0)
    batch, seq, d_model = 2, 8, 32
    eps = 1e-6

    x = jax.random.normal(key, (batch, seq, d_model), dtype=jnp.float32)

    # Deterministic parameter init, matching nn.Parameter(torch.ones/zeros(d_model))
    alpha = jnp.ones((d_model,), dtype=jnp.float32)
    bias = jnp.zeros((d_model,), dtype=jnp.float32)

    out = layer_norm(x, alpha, bias, eps=eps)
    out = jax.block_until_ready(out)

    # Reference check (pure JAX, same unbiased-std semantics as torch.std)
    mean = jnp.mean(x, axis=-1, keepdims=True)
    std = jnp.sqrt(jnp.sum((x - mean) ** 2, axis=-1, keepdims=True) / (d_model - 1))
    ref = alpha * (x - mean) / (std + eps) + bias
    assert jnp.allclose(out, ref, atol=1e-5, rtol=1e-5), "mismatch vs reference"

    print("KERNEL_OK")
</pallas_src>

<mosaic_0001>
module attributes {stable_mosaic.version = 11 : i64} {
  func.func @_layernorm_kernel(%arg0: i32, %arg1: memref<16x32xf32, #tpu.memory_space<vmem>>, %arg2: memref<1x32xf32, #tpu.memory_space<vmem>>, %arg3: memref<1x32xf32, #tpu.memory_space<vmem>>, %arg4: memref<16x32xf32, #tpu.memory_space<vmem>>) attributes {dimension_semantics = [#tpu.dimension_semantics<parallel>], iteration_bounds = array<i64: 1>, scalar_prefetch = 0 : i64, scratch_operands = 0 : i64, tpu.core_type = #tpu.core_type<tc>, window_params = [{transform_indices = @transform_0, window_bounds = array<i64: 16, 32>}, {pipeline_mode = #tpu.pipeline_mode<synchronous>, transform_indices = @transform_1, window_bounds = array<i64: 1, 32>}, {pipeline_mode = #tpu.pipeline_mode<synchronous>, transform_indices = @transform_2, window_bounds = array<i64: 1, 32>}, {transform_indices = @transform_3, window_bounds = array<i64: 16, 32>}]} {
    %c0 = arith.constant 0 : index
    %c0_0 = arith.constant 0 : index
    %0 = vector.load %arg1[%c0, %c0_0] : memref<16x32xf32, #tpu.memory_space<vmem>>, vector<16x32xf32>
    %c0_1 = arith.constant 0 : index
    %c0_2 = arith.constant 0 : index
    %1 = vector.load %arg2[%c0_1, %c0_2] : memref<1x32xf32, #tpu.memory_space<vmem>>, vector<1x32xf32>
    %c0_3 = arith.constant 0 : index
    %c0_4 = arith.constant 0 : index
    %2 = vector.load %arg3[%c0_3, %c0_4] : memref<1x32xf32, #tpu.memory_space<vmem>>, vector<1x32xf32>
    %cst = arith.constant dense<0.000000e+00> : vector<16xf32>
    %3 = vector.multi_reduction <add>, %0, %cst [1] : vector<16x32xf32> to vector<16xf32>
    %4 = vector.shape_cast %3 : vector<16xf32> to vector<16x1xf32>
    %cst_5 = arith.constant 3.125000e-02 : f32
    %5 = vector.broadcast %cst_5 : f32 to vector<16x1xf32>
    %6 = arith.mulf %4, %5 : vector<16x1xf32>
    %7 = vector.broadcast %6 : vector<16x1xf32> to vector<16x32xf32>
    %8 = arith.subf %0, %7 : vector<16x32xf32>
    %9 = arith.mulf %8, %8 : vector<16x32xf32>
    %cst_6 = arith.constant dense<0.000000e+00> : vector<16xf32>
    %10 = vector.multi_reduction <add>, %9, %cst_6 [1] : vector<16x32xf32> to vector<16xf32>
    %11 = vector.shape_cast %10 : vector<16xf32> to vector<16x1xf32>
    %cst_7 = arith.constant 0.0322580636 : f32
    %12 = vector.broadcast %cst_7 : f32 to vector<16x1xf32>
    %13 = arith.mulf %11, %12 : vector<16x1xf32>
    %14 = math.sqrt %13 : vector<16x1xf32>
    %cst_8 = arith.constant 9.99999997E-7 : f32
    %15 = vector.broadcast %cst_8 : f32 to vector<16x1xf32>
    %16 = arith.addf %14, %15 : vector<16x1xf32>
    %17 = tpu.reciprocal %16 : vector<16x1xf32> -> vector<16x1xf32>
    %18 = vector.broadcast %17 : vector<16x1xf32> to vector<16x32xf32>
    %19 = arith.mulf %8, %18 : vector<16x32xf32>
    %20 = vector.broadcast %1 : vector<1x32xf32> to vector<16x32xf32>
    %21 = arith.mulf %19, %20 : vector<16x32xf32>
    %22 = vector.broadcast %2 : vector<1x32xf32> to vector<16x32xf32>
    %23 = arith.addf %21, %22 : vector<16x32xf32>
    %c0_9 = arith.constant 0 : index
    %c0_10 = arith.constant 0 : index
    %24 = vector.load %arg4[%c0_9, %c0_10] : memref<16x32xf32, #tpu.memory_space<vmem>>, vector<16x32xf32>
    tpu.vector_store %arg4[%c0_9, %c0_10], %23 {strides = array<i32>} : memref<16x32xf32, #tpu.memory_space<vmem>>, vector<16x32xf32>,
    return
  }
  func.func @transform_0(%arg0: i32) -> (i32, i32) {
    %c0_i32 = arith.constant 0 : i32
    %c0_i32_0 = arith.constant 0 : i32
    return %arg0, %c0_i32 : i32, i32
  }
  func.func @transform_1(%arg0: i32) -> (i32, i32) {
    %c0_i32 = arith.constant 0 : i32
    %c0_i32_0 = arith.constant 0 : i32
    %c0_i32_1 = arith.constant 0 : i32
    return %c0_i32, %c0_i32_0 : i32, i32
  }
  func.func @transform_2(%arg0: i32) -> (i32, i32) {
    %c0_i32 = arith.constant 0 : i32
    %c0_i32_0 = arith.constant 0 : i32
    %c0_i32_1 = arith.constant 0 : i32
    return %c0_i32, %c0_i32_0 : i32, i32
  }
  func.func @transform_3(%arg0: i32) -> (i32, i32) {
    %c0_i32 = arith.constant 0 : i32
    %c0_i32_0 = arith.constant 0 : i32
    return %arg0, %c0_i32 : i32, i32
  }
}

</mosaic_0001>

<bundles_post_ra>
// kernel: tpu_custom_call.1
= control target key start
LH: loop header
LB: loop body
LE: loop exit
PB: predicated region body
PF: predicated region fallthrough
CT: control target
= control target key end

     0   :  { %8 = vsyncpa [#allocation3], 0  ;;  %s215_s0 = inlined_call_operand.hbm [shape: f32[16,32], index: 0, kind: input, shape index: {}]   ;;  %s216_s1 = inlined_call_operand.vmem [shape: f32[1,32], index: 1, kind: input, shape index: {}]   ;;  %s217_s2 = inlined_call_operand.vmem [shape: f32[1,32], index: 2, kind: input, shape index: {}]   ;;  %s218_s3 = inlined_call_operand.hbm [shape: f32[16,32], index: 3, kind: output, shape index: {}]  }
   0x1   :  { %9 = vsyncpa [#allocation4], 0  ;;  %s167_s12 = smov [#allocation2]  }
   0x2   :  { %s15_s13 = sshll.u32 %s167_s12, 4  ;;  %s16_s13 = int_to_ptr.vmem [resolvable:$true] %s15_s13 }
   0x3   :  { %s131_s14 = scalar_lea.vmem %s16_s13, 256  ;;  %p136_p1 = scmp.lt.s32.totalorder %s16_s13, %s16_s13 }
   0x4   :  { %p132_p0 = scmp.ne.s32.totalorder %s16_s13, %s131_s14  ;;  %p137_p2 = scmp.lt.s32.totalorder %s131_s14, %s131_s14 }
   0x6   :  { %p138_p3 = por %p137_p2, %p136_p1 }
   0x8   :  { %p139_p4 = pnand %p138_p3, %p132_p0 }
   0xa   :  { %142 = shalt.err (!%p139_p4)
}
   0xb   :  { %s168_s15 = smov 128   ;;  %s169_s16 = smov 8  }
   0xc   :  { %21 = dma.hbm_to_vmem [thread:$0]  %s215_s0, 256, %s16_s13, [#allocation3], %s168_s15, %s168_s15, %s169_s16  }
   0xd   :  { %163 = dma.done.wait [#allocation3], 256  }
   0xe   :  { %164 = vsyncadd [#allocation3], 4294967040  ;;  %vm33_vm0 = vcmask 261120   ;;  %v29_v0 = vld [vmem:[#allocation2] sm:$0xff]  ;;  %v30_v1 = vld [vmem:[#allocation2 + $0x8] sm:$0xff]  ;;  %s170_s22 = smov [#allocation5]  }
   0xf   :  { %v34_v2 = vsel %vm33_vm0, %v29_v0, 0.0  ;;  %v37_v3 = vsel %vm33_vm0, %v30_v1, 0.0  ;;  %v109_v31 = vld [vmem:[%s216_s1] ss:$0 sm:$0xff]  ;;  %s97_s23 = sshll.u32 %s170_s22, 4  ;;  %s98_s23 = int_to_ptr.vmem [resolvable:$true] %s97_s23 }
  0x10   :  { %35 = vadd.xlane.f32.xlu0 %v34_v2  ;;  %v110_v33 = vld [vmem:[%s217_s2] ss:$0 sm:$0xff]  ;;  %s143_s24 = scalar_lea.vmem %s98_s23, 256  ;;  %p148_p6 = scmp.lt.s32.totalorder %s98_s23, %s98_s23 }
  0x11   :  { %p144_p5 = scmp.ne.s32.totalorder %s98_s23, %s143_s24  ;;  %p149_p7 = scmp.lt.s32.totalorder %s143_s24, %s143_s24 }
  0x13   :  { %p150_p8 = por %p149_p7, %p148_p6 }
  0x14   :  { %38 = vadd.xlane.f32.xlu0 %v37_v3 }
  0x15   :  { %p151_p9 = pnand %p150_p8, %p144_p5 }
  0x99   :  { %v36_v4 = vpop.xlane.xlu0 %35 }
  0x9a   :  { %v40_v5 = vmul.f32 0.03125, %v36_v4 }
  0x9c   :  { %v42_v6 = vsub.f32 %v29_v0, %v40_v5 }
  0x9d   :  { %v39_v7 = vpop.xlane.xlu0 %38 }
  0x9e   :  { %v41_v8 = vmul.f32 0.03125, %v39_v7  ;;  %v44_v9 = vmul.f32 %v42_v6, %v42_v6 }
  0xa0   :  { %v43_v10 = vsub.f32 %v30_v1, %v41_v8  ;;  %v46_v11 = vsel %vm33_vm0, %v44_v9, 0.0 }
  0xa1   :  { %47 = vadd.xlane.f32.xlu1 %v46_v11 }
  0xa2   :  { %v45_v12 = vmul.f32 %v43_v10, %v43_v10 }
  0xa4   :  { %v49_v13 = vsel %vm33_vm0, %v45_v12, 0.0 }
  0xa5   :  { %50 = vadd.xlane.f32.xlu1 %v49_v13 }
 0x12a   :  { %v48_v14 = vpop.xlane.xlu1 %47 }
 0x12b   :  { %v52_v15 = vmul.f32 0.032258064, %v48_v14 }
 0x12d   :  { %115 = vrsqrt.f32 %v52_v15  ;;  %vm56_vm1 = vcmp.eq.f32.partialorder %v52_v15, inf  ;;  %v59_v20 = vand.u32 2147483648, %v52_v15  ;;  %vm58_vm2 = vcmp.eq.f32.partialorder %v52_v15, 0.0 }
 0x12e   :  { %v51_v16 = vpop.xlane.xlu1 %50 }
 0x12f   :  { %v53_v17 = vmul.f32 0.032258064, %v51_v16 }
 0x131   :  { %117 = vrsqrt.f32 %v53_v17  ;;  %vm63_vm3 = vcmp.eq.f32.partialorder %v53_v17, inf  ;;  %v66_v26 = vand.u32 2147483648, %v53_v17  ;;  %vm65_vm4 = vcmp.eq.f32.partialorder %v53_v17, 0.0 }
 0x13a   :  { %v116_v18 = vpop.eup %115 }
 0x13b   :  { %v55_v19 = vmul.f32 %v116_v18, %v52_v15 }
 0x13d   :  { %v57_v21 = vsel %vm56_vm1, %v52_v15, %v55_v19 }
 0x13e   :  { %v118_v22 = vpop.eup %117  ;;  %v60_v23 = vsel %vm58_vm2, %v59_v20, %v57_v21 }
 0x13f   :  { %v68_v24 = vadd.f32 1e-06, %v60_v23  ;;  %v62_v25 = vmul.f32 %v118_v22, %v53_v17 }
 0x141   :  { %119 = vrcp.f32 %v68_v24  ;;  %v64_v27 = vsel %vm63_vm3, %v53_v17, %v62_v25 }
 0x142   :  { %v67_v28 = vsel %vm65_vm4, %v66_v26, %v64_v27 }
 0x143   :  { %v69_v29 = vadd.f32 1e-06, %v67_v28 }
 0x145   :  { %121 = vrcp.f32 %v69_v29 }
 0x14e   :  { %v120_v30 = vpop.eup %119 }
 0x14f   :  { %v72_v32 = vmul.f32 %v120_v30, %v42_v6 }
 0x151   :  { %v80_v34 = vmul.f32 %v109_v31, %v72_v32 }
 0x152   :  { %v122_v35 = vpop.eup %121 }
 0x153   :  { %v73_v36 = vmul.f32 %v122_v35, %v43_v10  ;;  %v88_v37 = vadd.f32 %v110_v33, %v80_v34 }
 0x155   :  { %v81_v38 = vmul.f32 %v109_v31, %v73_v36  ;;  %90 = vst.msk [vmem:[#allocation5] sm:$0xff] %vm33_vm0, %v88_v37 }
 0x157   :  { %v89_v39 = vadd.f32 %v110_v33, %v81_v38 }
 0x159   :  { %91 = vst.msk [vmem:[#allocation5 + $0x8] sm:$0xff] %vm33_vm0, %v89_v39 }
 0x15a   :  { %154 = shalt.err (!%p151_p9)
}
 0x15b   :  { %103 = dma.vmem_to_hbm [thread:$0]  %s98_s23, 256, %s218_s3, [#allocation4], %s168_s15, %s168_s15, %s169_s16  }
 0x15c   :  { %165 = dma.done.wait [#allocation4], 256  }
 0x15d   :  { %166 = vsyncadd [#allocation4], 4294967040 }
 0x15e   :  { %107 = vsyncpa [#allocation3], 1 }
 0x15f   :  { %108 = vsyncpa [#allocation4], 1 }

</bundles_post_ra>
